<compile_context>
chip_gen: v7x
topology: tpu7x:2x2x1
jax: 0.10.0
libtpu: 0.0.40
codegen_flags: <defaults>
</compile_context>

<pallas_src>
import functools

import jax
import jax.numpy as jnp
from jax.experimental import pallas as pl
from jax.experimental.pallas import tpu as pltpu

BN_EPS = 1e-5


def _ternary_block_kernel(*refs, stride, shortcut_mode, Cm, W):
    o_ref = refs[-1]
    x_ref, wtop_ref, mw_ref, b2_ref, w3_ref, b3_ref = refs[:6]
    sel_ref = refs[6] if stride != 1 else None

    Cout = o_ref.shape[0]

    # x is (Cin+1, lanes): channel-major, images packed on lanes, last row == 1 (bias feed).
    x2d = x_ref[...].astype(jnp.float32)

    # --- conv1 (1x1 expand) + fused 1x1 shortcut conv, biases folded into the MXU -----------
    # wtop rows: [w1*s1 | b1] and, for a conv shortcut, [ws*ss | bs] stacked below.
    hs = jnp.dot(wtop_ref[...], x2d, preferred_element_type=jnp.float32)
    h1 = jnp.maximum(hs[:Cm], 0.0)                       # (Cm, lanes)

    # --- conv2 (3x3 depthwise, pad=1, BN2 scale folded) --------------------------------------
    # Lane p of image i encodes flat position q = p % L; tap (dh, dw) = XLU lane roll by
    # dh*W + dw, multiplied by the pre-masked weight plane mw[k] (zero at image borders).
    n_lanes = h1.shape[1]
    acc = h1 * mw_ref[4]                                 # centre tap: mask is all-ones
    k = 0
    for dh in (-1, 0, 1):
        for dw in (-1, 0, 1):
            if dh == 0 and dw == 0:
                k += 1
                continue
            s = dh * W + dw
            shift = (-s) % n_lanes                       # jnp.roll convention
            acc = acc + pltpu.roll(h1, shift, 1) * mw_ref[k]
            k += 1

    if stride != 1:
        # one-hot subsample on the lane axis (block-diagonal per packed image)
        acc = jnp.dot(acc, sel_ref[...], preferred_element_type=jnp.float32)

    h2 = jnp.maximum(acc + b2_ref[...], 0.0)             # (Cm, out_lanes)

    # --- conv3 (1x1 project, BN3 scale folded) + bias ----------------------------------------
    h3 = jnp.dot(w3_ref[...], h2, preferred_element_type=jnp.float32) + b3_ref[...]

    # --- residual -----------------------------------------------------------------------------
    if stride == 1:
        if shortcut_mode == "identity":
            h3 = h3 + x2d[:Cout, :]
        elif shortcut_mode == "conv":
            h3 = h3 + hs[Cm:Cm + Cout]

    o_ref[...] = h3.astype(o_ref.dtype)                  # lane-dense (Cout, out_lanes) store


def _fold_bn(gamma, beta, mean, var):
    scale = gamma / jnp.sqrt(var + BN_EPS)
    bias = beta - mean * scale
    return scale, bias


def ternary_block_forward(x, params, *, stride, shortcut_mode):
    """x: NCHW (N, Cin, H, W); params: PyTorch-layout conv weights + raw BN stats."""
    N, Cin, H, W = x.shape
    Cm = params["w1"].shape[0]
    Cout = params["w3"].shape[0]
    Ho = (H + 2 - 3) // stride + 1
    Wo = (W + 2 - 3) // stride + 1
    L, Lo = H * W, Ho * Wo

    # Images per grid step: smallest divisor of N that makes the output lane axis a multiple
    # of 128 (lane-dense unmasked stores); keeps grid >= 2 "parallel" steps when possible.
    n_sub = N
    for d in range(1, N + 1):
        if N % d == 0 and (d * Lo) % 128 == 0:
            n_sub = d
            break
    n_steps = N // n_sub
    n_in = n_sub * L
    n_out = n_sub * Lo

    # ---- BN folding into conv weights --------------------------------------------------------
    s1, b1 = _fold_bn(params["g1"], params["be1"], params["m1"], params["v1"])
    s2, b2 = _fold_bn(params["g2"], params["be2"], params["m2"], params["v2"])
    s3, b3 = _fold_bn(params["g3"], params["be3"], params["m3"], params["v3"])
    w1f = params["w1"].reshape(Cm, Cin) * s1[:, None]
    w2f = params["w2"].reshape(Cm, 9) * s2[:, None]
    w3f = params["w3"].reshape(Cout, Cm) * s3[:, None]

    # conv1 weights with bias column; fused conv-shortcut rows stacked below.
    w_top = jnp.concatenate([w1f, b1[:, None]], axis=1)                  # (Cm, Cin+1)
    if shortcut_mode == "conv":
        ss, bs = _fold_bn(params["gs"], params["bes"], params["ms"], params["vs"])
        wsf = params["ws"].reshape(Cout, Cin) * ss[:, None]
        w_top = jnp.concatenate(
            [w_top, jnp.concatenate([wsf, bs[:, None]], axis=1)], axis=0)  # (Cm+Cout, Cin+1)

    # ---- pre-masked depthwise weight planes (9, Cm, n_in) ------------------------------------
    q = jnp.arange(L)
    hh, ww = q // W, q % W
    masks = []
    for dh in (-1, 0, 1):
        for dw in (-1, 0, 1):
            m = ((hh + dh >= 0) & (hh + dh < H) & (ww + dw >= 0) & (ww + dw < W))
            masks.append(m.astype(jnp.float32))
    masks = jnp.tile(jnp.stack(masks), (1, n_sub))                       # (9, n_in)
    mw = w2f.T[:, :, None] * masks[:, None, :]                           # (9, Cm, n_in)

    # ---- x: channel-major, images packed on the lane axis, ones row for bias-through-MXU ----
    x_cm = (x.reshape(n_steps, n_sub, Cin, L)
              .transpose(0, 2, 1, 3)
              .reshape(n_steps, Cin, n_in))
    x_aug = jnp.concatenate(
        [x_cm, jnp.ones((n_steps, 1, n_in), x_cm.dtype)], axis=1)        # (n_steps, Cin+1, n_in)

    inputs = [x_aug, w_top, mw, b2.reshape(Cm, 1), w3f, b3.reshape(Cout, 1)]
    if stride != 1:
        # one-hot block-diagonal lane subsample
        # TODO(synk): O(L*Lo) — replace with a factorized / stride-folded scheme at large H*W.
        qo = jnp.arange(Lo)
        rows = (stride * (qo // Wo)) * W + stride * (qo % Wo)
        sel_single = jnp.zeros((L, Lo), jnp.float32).at[rows, qo].set(1.0)
        sel = jnp.kron(jnp.eye(n_sub, dtype=jnp.float32), sel_single)    # (n_in, n_out)
        inputs.append(sel)

    def full_spec(a):
        nd = a.ndim
        return pl.BlockSpec(a.shape, lambda n, _nd=nd: (0,) * _nd)

    in_specs = [pl.BlockSpec((None, Cin + 1, n_in), lambda n: (n, 0, 0))]
    in_specs += [full_spec(a) for a in inputs[1:]]
    out_spec = pl.BlockSpec((None, Cout, n_out), lambda n: (n, 0, 0))

    kernel = functools.partial(_ternary_block_kernel, stride=stride,
                               shortcut_mode=shortcut_mode, Cm=Cm, W=W)
    out_cm = pl.pallas_call(
        kernel,
        out_shape=jax.ShapeDtypeStruct((n_steps, Cout, n_out), jnp.float32),
        grid_spec=pltpu.PrefetchScalarGridSpec(
            num_scalar_prefetch=0,
            grid=(n_steps,),
            in_specs=in_specs,
            out_specs=out_spec,
        ),
        compiler_params=pltpu.CompilerParams(
            dimension_semantics=("parallel",)),
    )(*inputs)

    return (out_cm.reshape(n_steps, Cout, n_sub, Lo)
                  .transpose(0, 2, 1, 3)
                  .reshape(N, Cout, Ho, Wo))


def reference_forward(x, params, stride, shortcut_mode):
    """Pure-JAX/XLA reference (lax convolutions, NCHW, PyTorch semantics)."""
    def conv(h, w, stride=1, padding=0, groups=1):
        return jax.lax.conv_general_dilated(
            h, w, window_strides=(stride, stride),
            padding=[(padding, padding), (padding, padding)],
            dimension_numbers=("NCHW", "OIHW", "NCHW"),
            feature_group_count=groups,
            precision=jax.lax.Precision.HIGHEST)

    def bn(h, g, be, m, v):
        s = g / jnp.sqrt(v + BN_EPS)
        b = be - m * s
        return h * s.reshape(1, -1, 1, 1) + b.reshape(1, -1, 1, 1)

    Cm = params["w1"].shape[0]
    h = jax.nn.relu(bn(conv(x, params["w1"]),
                       params["g1"], params["be1"], params["m1"], params["v1"]))
    h = jax.nn.relu(bn(conv(h, params["w2"], stride=stride, padding=1, groups=Cm),
                       params["g2"], params["be2"], params["m2"], params["v2"]))
    h = bn(conv(h, params["w3"]),
           params["g3"], params["be3"], params["m3"], params["v3"])
    if stride == 1:
        if shortcut_mode == "identity":
            h = h + x
        elif shortcut_mode == "conv":
            sc = bn(conv(x, params["ws"]),
                    params["gs"], params["bes"], params["ms"], params["vs"])
            h = h + sc
    return h


def _bn_raw(key, c):
    k1, k2, k3, k4 = jax.random.split(key, 4)
    gamma = 1.0 + 0.1 * jax.random.normal(k1, (c,), jnp.float32)
    beta = 0.1 * jax.random.normal(k2, (c,), jnp.float32)
    mean = 0.1 * jax.random.normal(k3, (c,), jnp.float32)
    var = 1.0 + 0.1 * jnp.abs(jax.random.normal(k4, (c,), jnp.float32))
    return gamma, beta, mean, var


def make_params(key, in_planes, out_planes, expansion):
    Cm = expansion * in_planes
    keys = jax.random.split(key, 8)
    p = {}
    p["w1"] = 0.3 * jax.random.normal(keys[0], (Cm, in_planes, 1, 1), jnp.float32)
    p["g1"], p["be1"], p["m1"], p["v1"] = _bn_raw(keys[1], Cm)
    p["w2"] = 0.3 * jax.random.normal(keys[2], (Cm, 1, 3, 3), jnp.float32)
    p["g2"], p["be2"], p["m2"], p["v2"] = _bn_raw(keys[3], Cm)
    p["w3"] = 0.3 * jax.random.normal(keys[4], (out_planes, Cm, 1, 1), jnp.float32)
    p["g3"], p["be3"], p["m3"], p["v3"] = _bn_raw(keys[5], out_planes)
    p["ws"] = 0.3 * jax.random.normal(keys[6], (out_planes, in_planes, 1, 1), jnp.float32)
    p["gs"], p["bes"], p["ms"], p["vs"] = _bn_raw(keys[7], out_planes)
    return p


if __name__ == "__main__":
    N, H, W = 2, 16, 16
    key = jax.random.PRNGKey(0)
    configs = [
        # (in_planes, out_planes, expansion, stride)
        (4, 8, 6, 1),   # in != out, stride 1 -> 1x1-conv + BN shortcut
        (8, 8, 4, 1),   # in == out, stride 1 -> identity shortcut
        (4, 8, 6, 2),   # stride 2 -> no residual
    ]
    for cfg_i, (cin, cout, exp, stride) in enumerate(configs):
        kx, kp = jax.random.split(jax.random.fold_in(key, cfg_i))
        x = jax.random.normal(kx, (N, cin, H, W), jnp.float32)
        params = make_params(kp, cin, cout, exp)
        if stride == 1:
            shortcut_mode = "identity" if cin == cout else "conv"
        else:
            shortcut_mode = "none"

        out = ternary_block_forward(x, params, stride=stride,
                                    shortcut_mode=shortcut_mode)
        out = jax.block_until_ready(out)
        ref = reference_forward(x, params, stride, shortcut_mode)
        assert out.shape == ref.shape, (cfg_i, out.shape, ref.shape)
        max_err = float(jnp.max(jnp.abs(out - ref)))
        assert max_err < 5e-3, f"config {cfg_i}: max abs error {max_err}"
    print("KERNEL_OK")
</pallas_src>

<mosaic_0001>
module attributes {stable_mosaic.version = 11 : i64} {
  func.func @_ternary_block_kernel(%arg0: i32, %arg1: memref<1x5x256xf32, #tpu.memory_space<vmem>>, %arg2: memref<32x5xf32, #tpu.memory_space<vmem>>, %arg3: memref<9x24x256xf32, #tpu.memory_space<vmem>>, %arg4: memref<24x1xf32, #tpu.memory_space<vmem>>, %arg5: memref<8x24xf32, #tpu.memory_space<vmem>>, %arg6: memref<8x1xf32, #tpu.memory_space<vmem>>, %arg7: memref<1x8x256xf32, #tpu.memory_space<vmem>>) attributes {dimension_semantics = [#tpu.dimension_semantics<parallel>], iteration_bounds = array<i64: 2>, scalar_prefetch = 0 : i64, scratch_operands = 0 : i64, tpu.core_type = #tpu.core_type<tc>, window_params = [{transform_indices = @transform_0, window_bounds = array<i64: 1, 5, 256>}, {pipeline_mode = #tpu.pipeline_mode<synchronous>, transform_indices = @transform_1, window_bounds = array<i64: 32, 5>}, {pipeline_mode = #tpu.pipeline_mode<synchronous>, transform_indices = @transform_2, window_bounds = array<i64: 9, 24, 256>}, {pipeline_mode = #tpu.pipeline_mode<synchronous>, transform_indices = @transform_3, window_bounds = array<i64: 24, 1>}, {pipeline_mode = #tpu.pipeline_mode<synchronous>, transform_indices = @transform_4, window_bounds = array<i64: 8, 24>}, {pipeline_mode = #tpu.pipeline_mode<synchronous>, transform_indices = @transform_5, window_bounds = array<i64: 8, 1>}, {transform_indices = @transform_6, window_bounds = array<i64: 1, 8, 256>}]} {
    %c0 = arith.constant 0 : index
    %c0_0 = arith.constant 0 : index
    %c0_1 = arith.constant 0 : index
    %0 = vector.load %arg1[%c0, %c0_0, %c0_1] : memref<1x5x256xf32, #tpu.memory_space<vmem>>, vector<1x5x256xf32>
    %1 = vector.shape_cast %0 : vector<1x5x256xf32> to vector<5x256xf32>
    %c0_2 = arith.constant 0 : index
    %c0_3 = arith.constant 0 : index
    %2 = vector.load %arg2[%c0_2, %c0_3] : memref<32x5xf32, #tpu.memory_space<vmem>>, vector<32x5xf32>
    %cst = arith.constant dense<0.000000e+00> : vector<32x256xf32>
    %3 = tpu.matmul %2, %1, %cst {dimension_numbers = #tpu.dot_dimension_numbers<[1], [0], [0], [1], [0, 0, 1, 1], [], []>} : vector<32x5xf32>, vector<5x256xf32>, vector<32x256xf32> -> vector<32x256xf32>
    %4 = vector.extract_strided_slice %3 {offsets = [0, 0], sizes = [24, 256], strides = [1, 1]} : vector<32x256xf32> to vector<24x256xf32>
    %cst_4 = arith.constant 0.000000e+00 : f32
    %5 = vector.broadcast %cst_4 : f32 to vector<24x256xf32>
    %6 = arith.maximumf %4, %5 : vector<24x256xf32>
    %c4 = arith.constant 4 : index
    %c0_5 = arith.constant 0 : index
    %c0_6 = arith.constant 0 : index
    %7 = vector.load %arg3[%c4, %c0_5, %c0_6] : memref<9x24x256xf32, #tpu.memory_space<vmem>>, vector<1x24x256xf32>
    %8 = vector.shape_cast %7 : vector<1x24x256xf32> to vector<24x256xf32>
    %9 = arith.mulf %6, %8 : vector<24x256xf32>
    %c17_i32 = arith.constant 17 : i32
    %10 = tpu.dynamic_rotate %6 by %c17_i32 dim 1 : vector<24x256xf32>, i32 -> vector<24x256xf32>
    %c0_7 = arith.constant 0 : index
    %c0_8 = arith.constant 0 : index
    %c0_9 = arith.constant 0 : index
    %11 = vector.load %arg3[%c0_7, %c0_8, %c0_9] : memref<9x24x256xf32, #tpu.memory_space<vmem>>, vector<1x24x256xf32>
    %12 = vector.shape_cast %11 : vector<1x24x256xf32> to vector<24x256xf32>
    %13 = arith.mulf %10, %12 : vector<24x256xf32>
    %14 = arith.addf %9, %13 : vector<24x256xf32>
    %c16_i32 = arith.constant 16 : i32
    %15 = tpu.dynamic_rotate %6 by %c16_i32 dim 1 : vector<24x256xf32>, i32 -> vector<24x256xf32>
    %c1 = arith.constant 1 : index
    %c0_10 = arith.constant 0 : index
    %c0_11 = arith.constant 0 : index
    %16 = vector.load %arg3[%c1, %c0_10, %c0_11] : memref<9x24x256xf32, #tpu.memory_space<vmem>>, vector<1x24x256xf32>
    %17 = vector.shape_cast %16 : vector<1x24x256xf32> to vector<24x256xf32>
    %18 = arith.mulf %15, %17 : vector<24x256xf32>
    %19 = arith.addf %14, %18 : vector<24x256xf32>
    %c15_i32 = arith.constant 15 : i32
    %20 = tpu.dynamic_rotate %6 by %c15_i32 dim 1 : vector<24x256xf32>, i32 -> vector<24x256xf32>
    %c2 = arith.constant 2 : index
    %c0_12 = arith.constant 0 : index
    %c0_13 = arith.constant 0 : index
    %21 = vector.load %arg3[%c2, %c0_12, %c0_13] : memref<9x24x256xf32, #tpu.memory_space<vmem>>, vector<1x24x256xf32>
    %22 = vector.shape_cast %21 : vector<1x24x256xf32> to vector<24x256xf32>
    %23 = arith.mulf %20, %22 : vector<24x256xf32>
    %24 = arith.addf %19, %23 : vector<24x256xf32>
    %c1_i32 = arith.constant 1 : i32
    %25 = tpu.dynamic_rotate %6 by %c1_i32 dim 1 : vector<24x256xf32>, i32 -> vector<24x256xf32>
    %c3 = arith.constant 3 : index
    %c0_14 = arith.constant 0 : index
    %c0_15 = arith.constant 0 : index
    %26 = vector.load %arg3[%c3, %c0_14, %c0_15] : memref<9x24x256xf32, #tpu.memory_space<vmem>>, vector<1x24x256xf32>
    %27 = vector.shape_cast %26 : vector<1x24x256xf32> to vector<24x256xf32>
    %28 = arith.mulf %25, %27 : vector<24x256xf32>
    %29 = arith.addf %24, %28 : vector<24x256xf32>
    %c255_i32 = arith.constant 255 : i32
    %30 = tpu.dynamic_rotate %6 by %c255_i32 dim 1 : vector<24x256xf32>, i32 -> vector<24x256xf32>
    %c5 = arith.constant 5 : index
    %c0_16 = arith.constant 0 : index
    %c0_17 = arith.constant 0 : index
    %31 = vector.load %arg3[%c5, %c0_16, %c0_17] : memref<9x24x256xf32, #tpu.memory_space<vmem>>, vector<1x24x256xf32>
    %32 = vector.shape_cast %31 : vector<1x24x256xf32> to vector<24x256xf32>
    %33 = arith.mulf %30, %32 : vector<24x256xf32>
    %34 = arith.addf %29, %33 : vector<24x256xf32>
    %c241_i32 = arith.constant 241 : i32
    %35 = tpu.dynamic_rotate %6 by %c241_i32 dim 1 : vector<24x256xf32>, i32 -> vector<24x256xf32>
    %c6 = arith.constant 6 : index
    %c0_18 = arith.constant 0 : index
    %c0_19 = arith.constant 0 : index
    %36 = vector.load %arg3[%c6, %c0_18, %c0_19] : memref<9x24x256xf32, #tpu.memory_space<vmem>>, vector<1x24x256xf32>
    %37 = vector.shape_cast %36 : vector<1x24x256xf32> to vector<24x256xf32>
    %38 = arith.mulf %35, %37 : vector<24x256xf32>
    %39 = arith.addf %34, %38 : vector<24x256xf32>
    %c240_i32 = arith.constant 240 : i32
    %40 = tpu.dynamic_rotate %6 by %c240_i32 dim 1 : vector<24x256xf32>, i32 -> vector<24x256xf32>
    %c7 = arith.constant 7 : index
    %c0_20 = arith.constant 0 : index
    %c0_21 = arith.constant 0 : index
    %41 = vector.load %arg3[%c7, %c0_20, %c0_21] : memref<9x24x256xf32, #tpu.memory_space<vmem>>, vector<1x24x256xf32>
    %42 = vector.shape_cast %41 : vector<1x24x256xf32> to vector<24x256xf32>
    %43 = arith.mulf %40, %42 : vector<24x256xf32>
    %44 = arith.addf %39, %43 : vector<24x256xf32>
    %c239_i32 = arith.constant 239 : i32
    %45 = tpu.dynamic_rotate %6 by %c239_i32 dim 1 : vector<24x256xf32>, i32 -> vector<24x256xf32>
    %c8 = arith.constant 8 : index
    %c0_22 = arith.constant 0 : index
    %c0_23 = arith.constant 0 : index
    %46 = vector.load %arg3[%c8, %c0_22, %c0_23] : memref<9x24x256xf32, #tpu.memory_space<vmem>>, vector<1x24x256xf32>
    %47 = vector.shape_cast %46 : vector<1x24x256xf32> to vector<24x256xf32>
    %48 = arith.mulf %45, %47 : vector<24x256xf32>
    %49 = arith.addf %44, %48 : vector<24x256xf32>
    %c0_24 = arith.constant 0 : index
    %c0_25 = arith.constant 0 : index
    %50 = vector.load %arg4[%c0_24, %c0_25] : memref<24x1xf32, #tpu.memory_space<vmem>>, vector<24x1xf32>
    %51 = vector.broadcast %50 : vector<24x1xf32> to vector<24x256xf32>
    %52 = arith.addf %49, %51 : vector<24x256xf32>
    %cst_26 = arith.constant 0.000000e+00 : f32
    %53 = vector.broadcast %cst_26 : f32 to vector<24x256xf32>
    %54 = arith.maximumf %52, %53 : vector<24x256xf32>
    %c0_27 = arith.constant 0 : index
    %c0_28 = arith.constant 0 : index
    %55 = vector.load %arg5[%c0_27, %c0_28] : memref<8x24xf32, #tpu.memory_space<vmem>>, vector<8x24xf32>
    %cst_29 = arith.constant dense<0.000000e+00> : vector<8x256xf32>
    %56 = tpu.matmul %55, %54, %cst_29 {dimension_numbers = #tpu.dot_dimension_numbers<[1], [0], [0], [1], [0, 0, 1, 1], [], []>} : vector<8x24xf32>, vector<24x256xf32>, vector<8x256xf32> -> vector<8x256xf32>
    %c0_30 = arith.constant 0 : index
    %c0_31 = arith.constant 0 : index
    %57 = vector.load %arg6[%c0_30, %c0_31] : memref<8x1xf32, #tpu.memory_space<vmem>>, vector<8x1xf32>
    %58 = vector.broadcast %57 : vector<8x1xf32> to vector<8x256xf32>
    %59 = arith.addf %56, %58 : vector<8x256xf32>
    %60 = vector.extract_strided_slice %3 {offsets = [24, 0], sizes = [8, 256], strides = [1, 1]} : vector<32x256xf32> to vector<8x256xf32>
    %61 = arith.addf %59, %60 : vector<8x256xf32>
    %c0_32 = arith.constant 0 : index
    %c0_33 = arith.constant 0 : index
    %c0_34 = arith.constant 0 : index
    %62 = vector.load %arg7[%c0_32, %c0_33, %c0_34] : memref<1x8x256xf32, #tpu.memory_space<vmem>>, vector<1x8x256xf32>
    %63 = vector.shape_cast %62 : vector<1x8x256xf32> to vector<8x256xf32>
    %64 = vector.shape_cast %61 : vector<8x256xf32> to vector<1x8x256xf32>
    tpu.vector_store %arg7[%c0_32, %c0_33, %c0_34], %64 {strides = array<i32>} : memref<1x8x256xf32, #tpu.memory_space<vmem>>, vector<1x8x256xf32>,
    return
  }
  func.func @transform_0(%arg0: i32) -> (i32, i32, i32) {
    %c0_i32 = arith.constant 0 : i32
    %c0_i32_0 = arith.constant 0 : i32
    %c0_i32_1 = arith.constant 0 : i32
    return %arg0, %c0_i32, %c0_i32_0 : i32, i32, i32
  }
  func.func @transform_1(%arg0: i32) -> (i32, i32) {
    %c0_i32 = arith.constant 0 : i32
    %c0_i32_0 = arith.constant 0 : i32
    %c0_i32_1 = arith.constant 0 : i32
    return %c0_i32, %c0_i32_0 : i32, i32
  }
  func.func @transform_2(%arg0: i32) -> (i32, i32, i32) {
    %c0_i32 = arith.constant 0 : i32
    %c0_i32_0 = arith.constant 0 : i32
    %c0_i32_1 = arith.constant 0 : i32
    %c0_i32_2 = arith.constant 0 : i32
    return %c0_i32, %c0_i32_0, %c0_i32_1 : i32, i32, i32
  }
  func.func @transform_3(%arg0: i32) -> (i32, i32) {
    %c0_i32 = arith.constant 0 : i32
    %c0_i32_0 = arith.constant 0 : i32
    %c0_i32_1 = arith.constant 0 : i32
    return %c0_i32, %c0_i32_0 : i32, i32
  }
  func.func @transform_4(%arg0: i32) -> (i32, i32) {
    %c0_i32 = arith.constant 0 : i32
    %c0_i32_0 = arith.constant 0 : i32
    %c0_i32_1 = arith.constant 0 : i32
    return %c0_i32, %c0_i32_0 : i32, i32
  }
  func.func @transform_5(%arg0: i32) -> (i32, i32) {
    %c0_i32 = arith.constant 0 : i32
    %c0_i32_0 = arith.constant 0 : i32
    %c0_i32_1 = arith.constant 0 : i32
    return %c0_i32, %c0_i32_0 : i32, i32
  }
  func.func @transform_6(%arg0: i32) -> (i32, i32, i32) {
    %c0_i32 = arith.constant 0 : i32
    %c0_i32_0 = arith.constant 0 : i32
    %c0_i32_1 = arith.constant 0 : i32
    return %arg0, %c0_i32, %c0_i32_0 : i32, i32, i32
  }
}

</mosaic_0001>

<bundles_post_ra>
// kernel: tpu_custom_call.1
= control target key start
LH: loop header
LB: loop body
LE: loop exit
PB: predicated region body
PF: predicated region fallthrough
CT: control target
= control target key end

     0   :  { %11 = vsyncpa [#allocation3], 0  ;;  %s1620_s0 = inlined_call_operand.vmem [shape: f32[2,5,256], index: 0, kind: input, shape index: {}]   ;;  %s1621_s1 = inlined_call_operand.vmem [shape: f32[32,5], index: 1, kind: input, shape index: {}]   ;;  %s1622_s2 = inlined_call_operand.hbm [shape: f32[9,24,256], index: 2, kind: input, shape index: {}]   ;;  %s1623_s3 = inlined_call_operand.vmem [shape: f32[24,1], index: 3, kind: input, shape index: {}]   ;;  %s1624_s4 = inlined_call_operand.vmem [shape: f32[8,24], index: 4, kind: input, shape index: {}]   ;;  %s1625_s5 = inlined_call_operand.vmem [shape: f32[8,1], index: 5, kind: input, shape index: {}]   ;;  %s1626_s6 = inlined_call_operand.hbm [shape: f32[2,8,256], index: 6, kind: output, shape index: {}]  }
   0x1   :  { %12 = vsyncpa [#allocation4], 0 }
   0x2   :  { %14 = vsyncpa [#allocation4 + $0x1], 0  ;;  %s1148_s21 = smov 0   ;;  %s1150_s22 = smov 0  }
   0x3   :  { %s1152_s23 = smov 0   ;;  %s1154_s24 = smov 0  }
   0x4 LB: > { %s1169_s25 = sadd.s32 4294967295, %s1097_s24   ;;  %s906_s26 = sadd.s32 4294967294, %s1097_s24   ;;  %s1097_s24 = sphi %s1154_s24, %s1642_s24   ;;  %s1093_s23 = sphi %s1152_s23, %s1641_s23   ;;  %s1089_s22 = sphi %s1150_s22, %s1640_s22   ;;  %s1085_s21 = sphi %s1148_s21, %s1639_s21  }
   0x5   : > { %s1173_s27 = sadd.s32 1, %s1097_s24   ;;  %s158_s28 = sadd.s32 1, %s1093_s23 }
   0x6   : > { %s155_s29 = ssub.s32 %s1097_s24, %s1173_s27  ;;  %p168_p0 = scmp.ne.s32.totalorder %s1093_s23, %s1089_s22 }
   0x7   : > { %p156_p1 = scmp.eq.s32.totalorder %s155_s29, 0  ;;  %p169_p2 = scmp.eq.s32.totalorder %s1169_s25, 1 }
   0x8   : > { %p174_p3 = scmp.ne.s32.totalorder %s1089_s22, %s1085_s21  ;;  %p175_p4 = scmp.eq.s32.totalorder %s906_s26, 1 }
   0x9   : > { %s1184_s30 = scalar_select %p156_p1, %s1093_s23, %s158_s28  }
   0xa   : > { %p1186_p5 = por %p169_p2, %p168_p0  ;;  %p1190_p6 = por %p175_p4, %p174_p3 }
   0xb   : > { %p907_p7 = scmp.ge.s32.totalorder %s1097_s24, 1  ;;  %p182_p8 = scmp.lt.s32.totalorder %s1097_s24, 3 }
   0xc   : > { %s1630_s7 = scalar_select %p1186_p5, 1, 0 }
   0xd   : > { %s1631_s8 = scalar_select %p1190_p6, 1, 0 }
   0xe   : > { %p1627_p9 = scmp.eq.s32.totalorder %s1169_s25, 0  ;;  %p1197_p10 = pnand %p907_p7, %p182_p8 }
   0xf   : > { %s1099_s10 = smov [#allocation2]   ;;  %s1003_s15 = scalar_lea.hbm %s1622_s2, 6912 }
  0x10   : > { %s1632_s9 = scalar_select %p1197_p10, 1, 0 }
  0x11   : > { %s197_s11 = sshll.u32 %s1099_s10, 4  ;;  %p945_p11 = pneg %p1197_p10  ;;  %s198_s11 = int_to_ptr.vmem [resolvable:$true] %s197_s11 }
  0x12   : > { %p1004_p13 = scmp.ne.s32.totalorder %s1622_s2, %s1003_s15  ;;  %p1010_p3 = scmp.lt.u32.totalorder %s1003_s15, %s1622_s2 }
  0x13   : > { %p1205_p12 = pnand %p1627_p9, %p945_p11 }
  0x15   : > { %p1005_p0 = pneg %p1205_p12 }
  0x17   : > { %p1006_p1 = pnand %p1005_p0, %p1004_p13 }
  0x19   : > { %p1007_p2 = pneg %p1006_p1 }
  0x1b   : > { %p1012_p4 = pnand %p1010_p3, %p1007_p2 }
  0x1d   : > { %1015 = shalt.err (!%p1012_p4)
}
  0x1e   : > { %s1016_s20 = scalar_lea.vmem %s198_s11, 6912  ;;  %p1024_p9 = scmp.lt.s32.totalorder %s198_s11, %s198_s11 }
  0x1f   : > { %p1017_p7 = scmp.ne.s32.totalorder %s198_s11, %s1016_s20  ;;  %p1025_p6 = scmp.lt.s32.totalorder %s1016_s20, %s1016_s20 }
  0x21   : > { %p1019_p8 = pnand %p1017_p7, %p1005_p0  ;;  %p1026_p5 = por %p1025_p6, %p1024_p9 }
  0x23   : > { %p1020_p11 = pneg %p1019_p8 }
  0x25   : > { %p1027_p10 = pnand %p1026_p5, %p1020_p11 }
  0x27   : > { %1030 = shalt.err (!%p1027_p10)
}
  0x28   : > { %s1100_s26 = smov 256   ;;  %s1101_s28 = smov 16  }
  0x29   : > { %948 = dma.hbm_to_vmem [thread:$0]  (!%p1205_p12), %s1622_s2, 6912, %s198_s11, [#allocation3], %s1100_s26, %s1100_s26, %s1101_s28  }
  0x2a   : > { %p1634_p13 = scmp.ne.s32.totalorder %s1632_s9, 0 }
  0x2b   : > { %p1635_p1 = scmp.eq.s32.totalorder (!%p1634_p13), %s1169_s25, 0 }
  0x2c   : > { %230 = sbr.rel (%p1634_p13) target bundleno = 739 (0x2e3), region = 44 }
  0x33   : > { %1076 = dma.done.wait (%p1635_p1), [#allocation3], 6912   ;;  %p1636_p0 = pmov %p1635_p1 }
  0x34   : > { %p260_p5 = scmp.lt.s32.totalorder %s1169_s25, 1  ;;  %v1102_v0 = vmov 0.0   ;;  %v1103_v1 = vmov 0   ;;  %vm284_vm0 = vcmask 1044480   ;;  %v267_v4 = vld [vmem:[%s1621_s1] sm:$0xff]  ;;  %vm271_vm1 = vcmask 39936  }
  0x35   : > { %1078 = vsyncadd (%p1636_p0), [#allocation3], 4294960384  ;;  %355 = vmatprep.mubr.f32.mxu0 %v1102_v0  ;;  %367 = vmatprep.mubr.f32.mxu1 %v1102_v0  ;;  %v269_v5 = vld [vmem:[%s1621_s1 + $0x10] sm:$0xff]  ;;  %v705_v6 = vld [vmem:[%s1623_s3 + $0x8] sm:$0xff]  ;;  %s1104_s13 = smov 127   ;;  %s1105_s9 = smov 17   ;;  %v411_v30 = vlaneseq }
  0x36   : > { %s261_s12 = scalar_select %p260_p5, %s1169_s25, 1  ;;  %1002 = vset.pattern.permute.xlu1 %v1103_v1  ;;  %1001 = vset.pattern.permute.xlu0 %v1103_v1  ;;  %v704_v7 = vld [vmem:[%s1623_s3] sm:$0xff]  ;;  %v268_v8 = vld [vmem:[%s1621_s1 + $0x8] sm:$0xff]  ;;  %v270_v9 = vld [vmem:[%s1621_s1 + $0x18] sm:$0xff]  ;;  %vm741_vm10 = vcmask 195584  }
  0x37   : > { %714 = vperm.xlu1 %1002, %v705_v6   ;;  %709 = vperm.xlu0 %1001, %v704_v7   ;;  %s1107_s15 = smov 16   ;;  %s1108_s16 = smov 113   ;;  %v706_v22 = vld [vmem:[%s1623_s3 + $0x10] sm:$0xff]  ;;  %v735_v24 = vld [vmem:[%s1625_s5] sm:$0xff]  ;;  %v1380_v33 = vand.u32 127, %v411_v30  ;;  %v388_v37 = vld [vmem:[#allocation2 + $0xc8] sm:$0xff] }
  0x38   : > { %s927_s11 = sshll.u32 %s261_s12, 4  ;;  %s1109_s17 = smov 15   ;;  %v387_v36 = vld [vmem:[#allocation2 + $0xc0] sm:$0xff]  ;;  %v421_v39 = vld [vmem:[#allocation2 + $0x8] sm:$0xff]  ;;  %v462_v60 = vld [vmem:[#allocation2 + $0x50] sm:$0xff] }
  0x39   : > { %s264_s14 = scalar_lea.vmem %s1620_s0, %s927_s11  ;;  %s1110_s18 = smov 1   ;;  %vm413_vm2 = vcmp.lt.s32.totalorder %v1380_v33, 17  ;;  %v420_v38 = vld [vmem:[#allocation2] sm:$0xff]  ;;  %v425_v49 = vld [vmem:[#allocation2 + $0x28] sm:$0xff]  ;;  %vm450_vm3 = vcmp.lt.s32.totalorder %v1380_v33, 16  ;;  %v463_v61 = vld [vmem:[#allocation2 + $0x58] sm:$0xff] }
  0x3a   : > { %v266_v2 = vld [vmem:[%s264_s14 + $0x8] sm:$0x1f]  ;;  %v265_v3 = vld [vmem:[%s264_s14] sm:$0x1f]  ;;  %s1106_s14 = smov 111   ;;  %s1111_s19 = smov 112  }
  0x3b   : > { %915 = vmatprep.subr.msk.mxu0 %vm284_vm0, %v266_v2  ;;  %933 = vmatprep.subr.msk.mxu1 %vm284_vm0, %v266_v2  ;;  %v424_v48 = vld [vmem:[#allocation2 + $0x20] sm:$0xff]  ;;  %v392_v55 = vld [vmem:[#allocation2 + $0xe8] sm:$0xff]  ;;  %vm488_vm4 = vcmp.lt.s32.totalorder %v1380_v33, 15  ;;  %vm526_vm5 = vcmp.lt.s32.totalorder %v1380_v33, 1  ;;  %vm564_vm6 = vcmp.lt.s32.totalorder %v1380_v33, 127  ;;  %vm602_vm7 = vcmp.lt.s32.totalorder %v1380_v33, 113 }
  0x3c   : > { %916 = vmatpush1.msk.msra.mxu0 %vm284_vm0, %v265_v3  ;;  %934 = vmatpush1.msk.msra.mxu1 %vm284_vm0, %v265_v3  ;;  %v391_v54 = vld [vmem:[#allocation2 + $0xe0] sm:$0xff]  ;;  %vm678_vm8 = vcmp.lt.s32.totalorder %v1380_v33, 111  ;;  %vm640_vm9 = vcmp.lt.s32.totalorder %v1380_v33, 112  ;;  %s257_s11 = sand.u32 1, %s1089_s22   ;;  %p1637_p9 = scmp.ne.s32.totalorder %s1630_s7, 0 }
  0x3d   : > { %917 = vmatmul.mubr.msk.f32.vlgmr.msra.gmra.mrb[0].mxu0 %vm271_vm1, %v267_v4  ;;  %919 = vmatmul.mubr.msk.f32.vlgmr.msra.gmra.mrb[0].mxu1 %vm271_vm1, %v269_v5  ;;  %s1112_s20 = smov [#allocation5]  }
  0x3e   : > { %361 = vmatprep.mubr.f32.mxu0 %v1102_v0  ;;  %373 = vmatprep.mubr.f32.mxu1 %v1102_v0  ;;  %s1035_s26 = sshll.u32 %s1112_s20, 4  ;;  %s1036_s26 = int_to_ptr.vmem [resolvable:$false] %s1035_s26 }
  0x3f   : > { %s1037_s28 = scalar_lea.vmem %s1036_s26, 512 }
  0x41   : > { %918 = vmatmul.mubr.msk.f32.gmra.mrb[2].mxu0 %vm271_vm1, %v268_v8  ;;  %920 = vmatmul.mubr.msk.f32.gmra.mrb[2].mxu1 %vm271_vm1, %v270_v9 }
  0x42   : > { %809 = vmatprep.mubr.f32.mxu0 %v1102_v0 }
  0xb6   : > { %v1370_v26 = vpop.permute.xlu1 %714  ;;  %v1372_v27 = vpop.permute.xlu0 %709 }
 0x110   : > { %v357_v10 = vpop.f32.mrb[0].mxu0  ;;  %v369_v11 = vpop.f32.mrb[0].mxu1 }
 0x111   : > { %v1258_v12 = vmax.f32 %v357_v10, 0.0  ;;  %v1260_v13 = vmax.f32 %v369_v11, 0.0  ;;  %v371_v14 = vpop.f32.mrb[1].mxu1  ;;  %v359_v15 = vpop.f32.mrb[1].mxu0 }
 0x112   : > { %v1274_v18 = vmax.f32 %v359_v15, 0.0  ;;  %v1280_v19 = vmax.f32 %v371_v14, 0.0 }
 0x113   : > { %556 = vrot.lane.b32.xlu1 %v1260_v13, %s1104_s13  ;;  %399 = vrot.lane.b32.xlu0 %v1258_v12, %s1105_s9  ;;  %v393_v44 = vmul.f32 %v387_v36, %v1258_v12  ;;  %v397_v62 = vmul.f32 %v391_v54, %v1260_v13  ;;  %v538_v36 = vld [vmem:[#allocation2 + $0xb0] sm:$0xff] }
 0x114   : > { %v363_v16 = vpop.f32.mrb[2].mxu0  ;;  %v1361_v23 = vpop.f32.mrb[2].mxu1  ;;  %v394_v45 = vmul.f32 %v388_v37, %v1274_v18  ;;  %v398_v63 = vmul.f32 %v392_v55, %v1280_v19  ;;  %v539_v37 = vld [vmem:[#allocation2 + $0xb8] sm:$0xff] }
 0x115   : > { %v365_v17 = vpop.f32.mrb[3].mxu0  ;;  %v1305_v20 = vmax.f32 %v363_v16, 0.0  ;;  %v1366_v25 = vpop.f32.mrb[3].mxu1 }
 0x116   : > { %v1329_v21 = vmax.f32 %v365_v17, 0.0 }
 0x117   : > { %666 = vrot.lane.b32.xlu1 %v1258_v12, %s1106_s14  ;;  %438 = vrot.lane.b32.xlu0 %v1258_v12, %s1107_s15 }
 0x11b   : > { %594 = vrot.lane.b32.xlu1 %v1260_v13, %s1108_s16  ;;  %476 = vrot.lane.b32.xlu0 %v1258_v12, %s1109_s17 }
 0x11f   : > { %403 = vrot.lane.b32.xlu0 %v1260_v13, %s1105_s9  ;;  %405 = vrot.lane.b32.xlu1 %v1274_v18, %s1105_s9 }
 0x123   : > { %514 = vrot.lane.b32.xlu0 %v1258_v12, %s1110_s18  ;;  %409 = vrot.lane.b32.xlu1 %v1280_v19, %s1105_s9 }
 0x127   : > { %442 = vrot.lane.b32.xlu0 %v1260_v13, %s1107_s15  ;;  %448 = vrot.lane.b32.xlu1 %v1280_v19, %s1107_s15 }
 0x12b   : > { %552 = vrot.lane.b32.xlu0 %v1258_v12, %s1104_s13  ;;  %486 = vrot.lane.b32.xlu1 %v1280_v19, %s1109_s17 }
 0x12f   : > { %480 = vrot.lane.b32.xlu0 %v1260_v13, %s1109_s17  ;;  %524 = vrot.lane.b32.xlu1 %v1280_v19, %s1110_s18 }
 0x133   : > { %590 = vrot.lane.b32.xlu0 %v1258_v12, %s1108_s16  ;;  %672 = vrot.lane.b32.xlu1 %v1274_v18, %s1106_s14 }
 0x137   : > { %518 = vrot.lane.b32.xlu0 %v1260_v13, %s1110_s18  ;;  %632 = vrot.lane.b32.xlu1 %v1260_v13, %s1111_s19 }
 0x13b   : > { %628 = vrot.lane.b32.xlu0 %v1258_v12, %s1111_s19  ;;  %440 = vrot.lane.b32.xlu1 %v1305_v20, %s1107_s15  ;;  %v500_v12 = vld [vmem:[#allocation2 + $0x80] sm:$0xff] }
 0x13f   : > { %444 = vrot.lane.b32.xlu0 %v1274_v18, %s1107_s15  ;;  %478 = vrot.lane.b32.xlu1 %v1305_v20, %s1109_s17 }
 0x143   : > { %482 = vrot.lane.b32.xlu0 %v1274_v18, %s1109_s17  ;;  %516 = vrot.lane.b32.xlu1 %v1305_v20, %s1110_s18 }
 0x147   : > { %520 = vrot.lane.b32.xlu0 %v1274_v18, %s1110_s18  ;;  %554 = vrot.lane.b32.xlu1 %v1305_v20, %s1104_s13 }
 0x14b   : > { %558 = vrot.lane.b32.xlu0 %v1274_v18, %s1104_s13  ;;  %592 = vrot.lane.b32.xlu1 %v1305_v20, %s1108_s16 }
 0x14f   : > { %596 = vrot.lane.b32.xlu0 %v1274_v18, %s1108_s16  ;;  %630 = vrot.lane.b32.xlu1 %v1305_v20, %s1111_s19 }
 0x153   : > { %634 = vrot.lane.b32.xlu0 %v1274_v18, %s1111_s19  ;;  %407 = vrot.lane.b32.xlu1 %v1329_v21, %s1105_s9 }
 0x157   : > { %562 = vrot.lane.b32.xlu0 %v1280_v19, %s1104_s13  ;;  %446 = vrot.lane.b32.xlu1 %v1329_v21, %s1107_s15 }
 0x15b   : > { %401 = vrot.lane.b32.xlu0 %v1305_v20, %s1105_s9  ;;  %484 = vrot.lane.b32.xlu1 %v1329_v21, %s1109_s17  ;;  %s928_s9 = sshll.u32 %s1169_s25, 8  ;;  %s821_s25 = scalar_lea.sflag [#allocation4], %s257_s11 }
 0x15f   : > { %600 = vrot.lane.b32.xlu0 %v1280_v19, %s1108_s16  ;;  %522 = vrot.lane.b32.xlu1 %v1329_v21, %s1110_s18  ;;  %s1578_s18 = scalar_lea.hbm %s1626_s6, %s928_s9 }
 0x163   : > { %668 = vrot.lane.b32.xlu0 %v1305_v20, %s1106_s14  ;;  %560 = vrot.lane.b32.xlu1 %v1329_v21, %s1104_s13  ;;  %s912_s13 = sshll.u32 %s257_s11, 4 }
 0x167   : > { %674 = vrot.lane.b32.xlu0 %v1329_v21, %s1106_s14  ;;  %598 = vrot.lane.b32.xlu1 %v1329_v21, %s1108_s16 }
 0x16b   : > { %638 = vrot.lane.b32.xlu0 %v1280_v19, %s1111_s19  ;;  %636 = vrot.lane.b32.xlu1 %v1329_v21, %s1111_s19 }
 0x16f   : > { %670 = vrot.lane.b32.xlu0 %v1260_v13, %s1106_s14  ;;  %719 = vperm.xlu1 %1002, %v706_v22   ;;  %v501_v13 = vld [vmem:[#allocation2 + $0x88] sm:$0xff] }
 0x173   : > { %738 = vperm.xlu0 %1001, %v735_v24   ;;  %676 = vrot.lane.b32.xlu1 %v1280_v19, %s1106_s14  ;;  %s259_s14 = scalar_lea.vmem [#allocation5], %s912_s13 }
 0x174   : > { %s835_s15 = sshll.u32 %s259_s14, 4  ;;  %s1580_s15 = int_to_ptr.vmem [resolvable:$true] %s835_s15 }
 0x175   : > { %s1031_s19 = scalar_lea.vmem %s1580_s15, 256  ;;  %p1038_p2 = scmp.lt.s32.totalorder %s1580_s15, %s1036_s26 }
 0x176   : > { %p1032_p6 = scmp.ne.s32.totalorder %s1580_s15, %s1031_s19  ;;  %p1039_p3 = scmp.lt.s32.totalorder %s1037_s28, %s1031_s19 }
 0x178   : > { %p1033_p10 = pnand %p1032_p6, %p1637_p9  ;;  %p1040_p4 = por %p1039_p3, %p1038_p2 }
 0x17a   : > { %p1034_p12 = pneg %p1033_p10 }
 0x17c   : > { %p1041_p7 = pnand %p1040_p4, %p1034_p12 }
 0x185   : > { %v1374_v28 = vpop.permute.xlu1 %556  ;;  %v400_v29 = vpop.permute.xlu0 %399 }
 0x189   : > { %v1376_v31 = vpop.permute.xlu1 %666  ;;  %v1378_v32 = vpop.permute.xlu0 %438 }
 0x18d   : > { %v1382_v34 = vpop.permute.xlu1 %594  ;;  %v1384_v35 = vpop.permute.xlu0 %476 }
 0x191   : > { %v404_v40 = vpop.permute.xlu0 %403  ;;  %v406_v41 = vpop.permute.xlu1 %405 }
 0x192   : > { %v414_v42 = vsel %vm413_vm2, %v400_v29, %v406_v41  ;;  %v417_v43 = vsel %vm413_vm2, %v406_v41, %v400_v29 }
 0x193   : > { %v426_v46 = vmul.f32 %v420_v38, %v417_v43  ;;  %v427_v47 = vmul.f32 %v421_v39, %v414_v42 }
 0x195   : > { %v1393_v50 = vadd.f32 %v426_v46, %v393_v44  ;;  %v1395_v51 = vadd.f32 %v427_v47, %v394_v45  ;;  %v1397_v52 = vpop.permute.xlu0 %514  ;;  %v410_v53 = vpop.permute.xlu1 %409 }
 0x196   : > { %v416_v56 = vsel %vm413_vm2, %v404_v40, %v410_v53  ;;  %v419_v57 = vsel %vm413_vm2, %v410_v53, %v404_v40 }
 0x197   : > { %v430_v58 = vmul.f32 %v424_v48, %v419_v57  ;;  %v431_v59 = vmul.f32 %v425_v49, %v416_v56  ;;  %v458_v48 = vld [vmem:[#allocation2 + $0x30] sm:$0xff]  ;;  %v459_v49 = vld [vmem:[#allocation2 + $0x38] sm:$0xff] }
 0x199   : > { %v443_v0 = vpop.permute.xlu0 %442  ;;  %v449_v1 = vpop.permute.xlu1 %448  ;;  %v436_v4 = vadd.f32 %v430_v58, %v397_v62  ;;  %v437_v5 = vadd.f32 %v431_v59, %v398_v63  ;;  %v496_v59 = vld [vmem:[#allocation2 + $0x60] sm:$0xff] }
 0x19a   : > { %v453_v2 = vsel %vm450_vm3, %v443_v0, %v449_v1  ;;  %v456_v3 = vsel %vm450_vm3, %v449_v1, %v443_v0 }
 0x19b   : > { %v468_v6 = vmul.f32 %v462_v60, %v456_v3  ;;  %v469_v7 = vmul.f32 %v463_v61, %v453_v2  ;;  %v497_v60 = vld [vmem:[#allocation2 + $0x68] sm:$0xff] }
 0x19d   : > { %v474_v8 = vadd.f32 %v468_v6, %v436_v4  ;;  %v475_v9 = vadd.f32 %v469_v7, %v437_v5  ;;  %v553_v10 = vpop.permute.xlu0 %552  ;;  %v487_v11 = vpop.permute.xlu1 %486 }
 0x1a1   : > { %v481_v14 = vpop.permute.xlu0 %480  ;;  %v525_v15 = vpop.permute.xlu1 %524 }
 0x1a2   : > { %v491_v16 = vsel %vm488_vm4, %v481_v14, %v487_v11  ;;  %v494_v17 = vsel %vm488_vm4, %v487_v11, %v481_v14 }
 0x1a3   : > { %v506_v18 = vmul.f32 %v500_v12, %v494_v17  ;;  %v507_v19 = vmul.f32 %v501_v13, %v491_v16  ;;  %v572_v12 = vld [vmem:[#allocation2 + $0xf0] sm:$0xff]  ;;  %v573_v13 = vld [vmem:[#allocation2 + $0xf8] sm:$0xff] }
 0x1a5   : > { %v512_v22 = vadd.f32 %v506_v18, %v474_v8  ;;  %v513_v24 = vadd.f32 %v507_v19, %v475_v9  ;;  %v591_v29 = vpop.permute.xlu0 %590  ;;  %v1415_v30 = vpop.permute.xlu1 %672  ;;  %v610_v18 = vld [vmem:[#allocation2 + $0x120] sm:$0xff]  ;;  %v611_v19 = vld [vmem:[#allocation2 + $0x128] sm:$0xff] }
 0x1a9   : > { %v519_v38 = vpop.permute.xlu0 %518  ;;  %v1418_v39 = vpop.permute.xlu1 %632 }
 0x1aa   : > { %v529_v40 = vsel %vm526_vm5, %v519_v38, %v525_v15  ;;  %v532_v41 = vsel %vm526_vm5, %v525_v15, %v519_v38 }
 0x1ab   : > { %v544_v42 = vmul.f32 %v538_v36, %v532_v41  ;;  %v545_v43 = vmul.f32 %v539_v37, %v529_v40 }
 0x1ad   : > { %v1424_v44 = vadd.f32 %v544_v42, %v512_v22  ;;  %v1426_v45 = vadd.f32 %v545_v43, %v513_v24  ;;  %v1428_v46 = vpop.permute.xlu0 %628  ;;  %v1430_v47 = vpop.permute.xlu1 %440  ;;  %v648_v43 = vld [vmem:[#allocation2 + $0x150] sm:$0xff] }
 0x1b1   : > { %v445_v53 = vpop.permute.xlu0 %444  ;;  %v1432_v54 = vpop.permute.xlu1 %478 }
 0x1b2   : > { %v451_v55 = vsel %vm450_vm3, %v1378_v32, %v445_v53  ;;  %v454_v56 = vsel %vm450_vm3, %v445_v53, %v1378_v32 }
 0x1b3   : > { %v464_v57 = vmul.f32 %v458_v48, %v454_v56  ;;  %v465_v58 = vmul.f32 %v459_v49, %v451_v55  ;;  %v649_v48 = vld [vmem:[#allocation2 + $0x158] sm:$0xff] }
 0x1b5   : > { %v470_v61 = vadd.f32 %v464_v57, %v1393_v50  ;;  %v471_v62 = vadd.f32 %v465_v58, %v1395_v51  ;;  %v483_v63 = vpop.permute.xlu0 %482  ;;  %v1442_v0 = vpop.permute.xlu1 %516  ;;  %v534_v50 = vld [vmem:[#allocation2 + $0x90] sm:$0xff]  ;;  %v535_v51 = vld [vmem:[#allocation2 + $0x98] sm:$0xff]  ;;  %v686_v57 = vld [vmem:[#allocation2 + $0x180] sm:$0xff] }
 0x1b6   : > { %v489_v1 = vsel %vm488_vm4, %v1384_v35, %v483_v63  ;;  %v492_v2 = vsel %vm488_vm4, %v483_v63, %v1384_v35  ;;  %v687_v58 = vld [vmem:[#allocation2 + $0x188] sm:$0xff] }
 0x1b7   : > { %v502_v32 = vmul.f32 %v496_v59, %v492_v2  ;;  %v503_v3 = vmul.f32 %v497_v60, %v489_v1  ;;  %v679_v59 = vsel %vm678_vm8, %v1376_v31, %v1415_v30 }
 0x1b9   : > { %v508_v4 = vadd.f32 %v502_v32, %v470_v61  ;;  %v509_v5 = vadd.f32 %v503_v3, %v471_v62  ;;  %v521_v6 = vpop.permute.xlu0 %520  ;;  %v1450_v7 = vpop.permute.xlu1 %554  ;;  %v692_v32 = vmul.f32 %v686_v57, %v679_v59  ;;  %v576_v57 = vld [vmem:[#allocation2 + $0x110] sm:$0xff] }
 0x1ba   : > { %v527_v8 = vsel %vm526_vm5, %v1397_v52, %v521_v6  ;;  %v530_v9 = vsel %vm526_vm5, %v521_v6, %v1397_v52 }
 0x1bb   : > { %v540_v16 = vmul.f32 %v534_v50, %v530_v9  ;;  %v541_v17 = vmul.f32 %v535_v51, %v527_v8  ;;  %v390_v8 = vld [vmem:[#allocation2 + $0xd8] sm:$0xff]  ;;  %v422_v9 = vld [vmem:[#allocation2 + $0x10] sm:$0xff] }
 0x1bd   : > { %v559_v35 = vpop.permute.xlu0 %558  ;;  %v1459_v11 = vpop.permute.xlu1 %592  ;;  %v547_v40 = vadd.f32 %v541_v17, %v509_v5 }
 0x1be   : > { %v565_v14 = vsel %vm564_vm6, %v553_v10, %v559_v35  ;;  %v568_v15 = vsel %vm564_vm6, %v559_v35, %v553_v10  ;;  %v546_v10 = vadd.f32 %v540_v16, %v508_v4  ;;  %v423_v35 = vld [vmem:[#allocation2 + $0x18] sm:$0xff] }
 0x1bf   : > { %v578_v22 = vmul.f32 %v572_v12, %v565_v14  ;;  %v579_v24 = vmul.f32 %v573_v13, %v568_v15  ;;  %v460_v13 = vld [vmem:[#allocation2 + $0x40] sm:$0xff]  ;;  %v461_v14 = vld [vmem:[#allocation2 + $0x48] sm:$0xff] }
 0x1c1   : > { %v597_v52 = vpop.permute.xlu0 %596  ;;  %v1466_v36 = vpop.permute.xlu1 %630  ;;  %v584_v49 = vadd.f32 %v578_v22, %v546_v10  ;;  %v585_v53 = vadd.f32 %v579_v24, %v547_v40  ;;  %v396_v22 = vmul.f32 %v390_v8, %v1329_v21 }
 0x1c2   : > { %v603_v37 = vsel %vm602_vm7, %v591_v29, %v597_v52  ;;  %v606_v38 = vsel %vm602_vm7, %v597_v52, %v591_v29  ;;  %v682_v29 = vsel %vm678_vm8, %v1415_v30, %v1376_v31  ;;  %v389_v30 = vld [vmem:[#allocation2 + $0xd0] sm:$0xff] }
 0x1c3   : > { %v616_v41 = vmul.f32 %v610_v18, %v603_v37  ;;  %v617_v42 = vmul.f32 %v611_v19, %v606_v38  ;;  %v693_v3 = vmul.f32 %v687_v58, %v682_v29  ;;  %v395_v19 = vmul.f32 %v389_v30, %v1305_v20  ;;  %v498_v37 = vld [vmem:[#allocation2 + $0x70] sm:$0xff]  ;;  %v499_v38 = vld [vmem:[#allocation2 + $0x78] sm:$0xff] }
 0x1c4   : > { %v577_v58 = vld [vmem:[#allocation2 + $0x118] sm:$0xff] }
 0x1c5   : > { %v635_v55 = vpop.permute.xlu0 %634  ;;  %v408_v56 = vpop.permute.xlu1 %407  ;;  %v622_v62 = vadd.f32 %v616_v41, %v584_v49  ;;  %v623_v63 = vadd.f32 %v617_v42, %v585_v53  ;;  %v536_v53 = vld [vmem:[#allocation2 + $0xa0] sm:$0xff] }
 0x1c6   : > { %v641_v60 = vsel %vm640_vm9, %v1428_v46, %v635_v55  ;;  %v644_v61 = vsel %vm640_vm9, %v635_v55, %v1428_v46  ;;  %v537_v55 = vld [vmem:[#allocation2 + $0xa8] sm:$0xff] }
 0x1c7   : > { %v654_v1 = vmul.f32 %v648_v43, %v641_v60  ;;  %v655_v2 = vmul.f32 %v649_v48, %v644_v61 }
 0x1c9   : > { %v660_v4 = vadd.f32 %v654_v1, %v622_v62  ;;  %v661_v5 = vadd.f32 %v655_v2, %v623_v63  ;;  %v563_v6 = vpop.permute.xlu0 %562  ;;  %v447_v50 = vpop.permute.xlu1 %446  ;;  %v574_v63 = vld [vmem:[#allocation2 + $0x100] sm:$0xff]  ;;  %v575_v1 = vld [vmem:[#allocation2 + $0x108] sm:$0xff] }
 0x1ca   : > { %v452_v15 = vsel %vm450_vm3, %v1430_v47, %v447_v50  ;;  %v455_v16 = vsel %vm450_vm3, %v447_v50, %v1430_v47  ;;  %v567_v21 = vsel %vm564_vm6, %v1374_v28, %v563_v6  ;;  %v570_v49 = vsel %vm564_vm6, %v563_v6, %v1374_v28 }
 0x1cb   : > { %v1488_v51 = vadd.f32 %v692_v32, %v660_v4  ;;  %v1490_v31 = vadd.f32 %v693_v3, %v661_v5  ;;  %v466_v40 = vmul.f32 %v460_v13, %v455_v16  ;;  %v467_v41 = vmul.f32 %v461_v14, %v452_v15  ;;  %v614_v3 = vld [vmem:[#allocation2 + $0x140] sm:$0xff]  ;;  %v612_v16 = vld [vmem:[#allocation2 + $0x130] sm:$0xff] }
 0x1cc   : > { %v582_v30 = vmul.f32 %v576_v57, %v567_v21  ;;  %v583_v8 = vmul.f32 %v577_v58, %v570_v49 }
 0x1cd   : > { %v402_v12 = vpop.permute.xlu0 %401  ;;  %v485_v46 = vpop.permute.xlu1 %484 }
 0x1ce   : > { %v415_v17 = vsel %vm413_vm2, %v402_v12, %v408_v56  ;;  %v418_v18 = vsel %vm413_vm2, %v408_v56, %v402_v12  ;;  %v490_v10 = vsel %vm488_vm4, %v1432_v54, %v485_v46  ;;  %v493_v47 = vsel %vm488_vm4, %v485_v46, %v1432_v54 }
 0x1cf   : > { %v428_v24 = vmul.f32 %v422_v9, %v418_v18  ;;  %v429_v52 = vmul.f32 %v423_v35, %v415_v17  ;;  %v504_v60 = vmul.f32 %v498_v37, %v493_v47  ;;  %v505_v61 = vmul.f32 %v499_v38, %v490_v10  ;;  %v613_v17 = vld [vmem:[#allocation2 + $0x138] sm:$0xff] }
 0x1d1   : > { %v434_v42 = vadd.f32 %v428_v24, %v395_v19  ;;  %v435_v43 = vadd.f32 %v429_v52, %v396_v22  ;;  %v601_v48 = vpop.permute.xlu0 %600  ;;  %v523_v20 = vpop.permute.xlu1 %522  ;;  %v588_v22 = vadd.f32 %v582_v30, %v1424_v44  ;;  %v589_v24 = vadd.f32 %v583_v8, %v1426_v45  ;;  %v651_v44 = vld [vmem:[#allocation2 + $0x168] sm:$0xff]  ;;  %v689_v45 = vld [vmem:[#allocation2 + $0x198] sm:$0xff] }
 0x1d2   : > { %v528_v54 = vsel %vm526_vm5, %v1442_v0, %v523_v20  ;;  %v531_v56 = vsel %vm526_vm5, %v523_v20, %v1442_v0  ;;  %v605_v28 = vsel %vm602_vm7, %v1382_v34, %v601_v48  ;;  %v608_v62 = vsel %vm602_vm7, %v601_v48, %v1382_v34  ;;  %v615_v0 = vld [vmem:[#allocation2 + $0x148] sm:$0xff]  ;;  %v650_v48 = vld [vmem:[#allocation2 + $0x160] sm:$0xff]  ;;  %v688_v20 = vld [vmem:[#allocation2 + $0x190] sm:$0xff] }
 0x1d3   : > { %v472_v59 = vadd.f32 %v466_v40, %v434_v42  ;;  %v473_v29 = vadd.f32 %v467_v41, %v435_v43  ;;  %v542_v4 = vmul.f32 %v536_v53, %v531_v56  ;;  %v543_v5 = vmul.f32 %v537_v55, %v528_v54  ;;  %v652_v40 = vld [vmem:[#allocation2 + $0x170] sm:$0xff]  ;;  %v653_v43 = vld [vmem:[#allocation2 + $0x178] sm:$0xff] }
 0x1d4   : > { %v620_v14 = vmul.f32 %v614_v3, %v605_v28  ;;  %v621_v15 = vmul.f32 %v615_v0, %v608_v62 }
 0x1d5   : > { %v510_v2 = vadd.f32 %v504_v60, %v472_v59  ;;  %v511_v32 = vadd.f32 %v505_v61, %v473_v29  ;;  %v669_v6 = vpop.permute.xlu0 %668  ;;  %v561_v50 = vpop.permute.xlu1 %560 }
 0x1d6   : > { %v566_v9 = vsel %vm564_vm6, %v1450_v7, %v561_v50  ;;  %v569_v34 = vsel %vm564_vm6, %v561_v50, %v1450_v7  ;;  %v626_v41 = vadd.f32 %v620_v14, %v588_v22  ;;  %v627_v42 = vadd.f32 %v621_v15, %v589_v24 }
 0x1d7   : > { %v548_v35 = vadd.f32 %v542_v4, %v510_v2  ;;  %v549_v12 = vadd.f32 %v543_v5, %v511_v32  ;;  %v580_v46 = vmul.f32 %v574_v63, %v566_v9  ;;  %v581_v13 = vmul.f32 %v575_v1, %v569_v34 }
 0x1d8   : > { %v723_v5 = vadd.f32 %v1372_v27, %v1490_v31 }
 0x1d9   : > { %v675_v18 = vpop.permute.xlu0 %674  ;;  %v599_v19 = vpop.permute.xlu1 %598  ;;  %v586_v37 = vadd.f32 %v580_v46, %v548_v35  ;;  %v587_v38 = vadd.f32 %v581_v13, %v549_v12  ;;  %v690_v46 = vld [vmem:[#allocation2 + $0x1a0] sm:$0xff] }
 0x1da   : > { %v604_v52 = vsel %vm602_vm7, %v1459_v11, %v599_v19  ;;  %v607_v7 = vsel %vm602_vm7, %v599_v19, %v1459_v11  ;;  %v680_v21 = vsel %vm678_vm8, %v669_v6, %v675_v18  ;;  %v683_v49 = vsel %vm678_vm8, %v675_v18, %v669_v6 }
 0x1db   : > { %v618_v10 = vmul.f32 %v612_v16, %v604_v52  ;;  %v619_v47 = vmul.f32 %v613_v17, %v607_v7  ;;  %v694_v62 = vmul.f32 %v688_v20, %v680_v21  ;;  %v695_v63 = vmul.f32 %v689_v45, %v683_v49  ;;  %v734_v52 = vld [vmem:[%s1624_s4] sm:$0xff] }
 0x1dc   : > { %v729_v8 = vmax.f32 %v723_v5, 0.0 }
 0x1dd   : > { %v624_v53 = vadd.f32 %v618_v10, %v586_v37  ;;  %v625_v11 = vadd.f32 %v619_v47, %v587_v38  ;;  %v639_v55 = vpop.permute.xlu0 %638  ;;  %v637_v54 = vpop.permute.xlu1 %636 }
 0x1de   : > { %v643_v56 = vsel %vm640_vm9, %v1418_v39, %v639_v55  ;;  %v646_v57 = vsel %vm640_vm9, %v639_v55, %v1418_v39  ;;  %v642_v58 = vsel %vm640_vm9, %v1466_v36, %v637_v54  ;;  %v645_v59 = vsel %vm640_vm9, %v637_v54, %v1466_v36 }
 0x1df   : > { %v658_v29 = vmul.f32 %v652_v40, %v643_v56  ;;  %v659_v60 = vmul.f32 %v653_v43, %v646_v57  ;;  %v656_v61 = vmul.f32 %v650_v48, %v642_v58  ;;  %v657_v28 = vmul.f32 %v651_v44, %v645_v59 }
 0x1e0   : > { %v722_v39 = vadd.f32 %v1372_v27, %v1488_v51  ;;  %v691_v51 = vld [vmem:[#allocation2 + $0x1a8] sm:$0xff] }
 0x1e1   : > { %v664_v1 = vadd.f32 %v658_v29, %v626_v41  ;;  %v665_v2 = vadd.f32 %v659_v60, %v627_v42  ;;  %v662_v32 = vadd.f32 %v656_v61, %v624_v53  ;;  %v663_v3 = vadd.f32 %v657_v28, %v625_v11  ;;  %v671_v13 = vpop.permute.xlu0 %670 }
 0x1e2   : > { %v728_v50 = vmax.f32 %v722_v39, 0.0 }
 0x1e3   : > { %v700_v0 = vadd.f32 %v694_v62, %v662_v32  ;;  %v701_v4 = vadd.f32 %v695_v63, %v663_v3 }
 0x1e5   : > { %v724_v36 = vadd.f32 %v1370_v26, %v700_v0  ;;  %v725_v6 = vadd.f32 %v1370_v26, %v701_v4 }
 0x1e7   : > { %v730_v30 = vmax.f32 %v724_v36, 0.0  ;;  %v731_v9 = vmax.f32 %v725_v6, 0.0 }
 0x1e9   : > { %v929_v34 = vpack.c.bf16 %v731_v9, %v729_v8  ;;  %v931_v35 = vpack.c.bf16 %v730_v30, %v728_v50 }
 0x1eb   : > { %930 = vmatprep.subr.bf16.mxu0 %v929_v34 }
 0x1ec   : > { %932 = vmatpush1.bf16.msra.mxu0 %v931_v35 }
 0x1ee   : > { %v720_v12 = vpop.permute.xlu1 %719 }
 0x1f2   : > { %v677_v14 = vpop.permute.xlu1 %676  ;;  %v739_v33 = vpop.permute.xlu0 %738 }
 0x1f3   : > { %v681_v27 = vsel %vm678_vm8, %v671_v13, %v677_v14  ;;  %v684_v26 = vsel %vm678_vm8, %v677_v14, %v671_v13  ;;  %v935_v7 = vadd.f32 %v739_v33, %v1361_v23  ;;  %v937_v37 = vadd.f32 %v739_v33, %v1366_v25 }
 0x1f4   : > { %v696_v31 = vmul.f32 %v690_v46, %v681_v27  ;;  %v697_v15 = vmul.f32 %v691_v51, %v684_v26 }
 0x1f6   : > { %v702_v16 = vadd.f32 %v696_v31, %v664_v1  ;;  %v703_v17 = vadd.f32 %v697_v15, %v665_v2 }
 0x1f8   : > { %v726_v18 = vadd.f32 %v720_v12, %v702_v16  ;;  %v727_v19 = vadd.f32 %v720_v12, %v703_v17 }
 0x1fa   : > { %v732_v22 = vmax.f32 %v726_v18, 0.0  ;;  %v733_v24 = vmax.f32 %v727_v19, 0.0 }
 0x1fc   : > { %749 = vmatprep.subr.mxu0 %v733_v24 }
 0x1fd   : > { %750 = vmatpush1.msra.mxu0 %v732_v22 }
 0x1fe   : > { %921 = vmatmul.mubr.msk.f32.vlgmr.msra.gmra.mrb[4].mxu0 %vm741_vm10, %v734_v52 }
 0x2d1   : > { %v811_v38 = vpop.f32.mrb[4].mxu0 }
 0x2d2   : > { %v936_v10 = vadd.f32 %v935_v7, %v811_v38  ;;  %v813_v47 = vpop.f32.mrb[5].mxu0 }
 0x2d3   : > { %v938_v40 = vadd.f32 %v937_v37, %v813_v47 }
 0x2d4   : > { %818 = vst [vmem:[%s259_s14] sm:$0xff] %v936_v10 }
 0x2d5   : > { %819 = vst [vmem:[%s259_s14 + $0x8] sm:$0xff] %v938_v40 }
 0x2d6   : > { %1044 = shalt.err (!%p1041_p7)
}
 0x2d7   : > { %s1045_s29 = scalar_lea.hbm %s1578_s18, 256  ;;  %s1049_s11 = scalar_lea.hbm %s1626_s6, 512 }
 0x2d8   : > { %p1046_p8 = scmp.ne.s32.totalorder %s1578_s18, %s1045_s29  ;;  %p1050_p1 = scmp.lt.u32.totalorder %s1578_s18, %s1626_s6 }
 0x2d9   : > { %p1051_p0 = scmp.lt.u32.totalorder %s1049_s11, %s1045_s29  ;;  %p1053_p6 = scmp.lt.u32.totalorder %s1045_s29, %s1578_s18 }
 0x2da   : > { %p1047_p11 = pnand %p1046_p8, %p1637_p9 }
 0x2db   : > { %p1052_p5 = por %p1051_p0, %p1050_p1 }
 0x2dc   : > { %p1048_p13 = pneg %p1047_p11 }
 0x2dd   : > { %p1054_p10 = por %p1053_p6, %p1052_p5 }
 0x2df   : > { %p1055_p12 = pnand %p1054_p10, %p1048_p13 }
 0x2e1   : > { %1058 = shalt.err (!%p1055_p12)
}
 0x2e2   : > { %943 = dma.vmem_to_hbm [thread:$0]  (%p1637_p9), %s1580_s15, 256, %s1578_s18, %s821_s25  }
 0x2e3 PF: > { %p955_p2 = scmp.ge.s32.totalorder %s1097_s24, 2  ;;  %s847_s14 = sand.u32 1, %s1085_s21  }
 0x2e4   : > { %p1638_p3 = scmp.ne.s32.totalorder %s1631_s8, 0  ;;  %s848_s16 = scalar_lea.sflag [#allocation4], %s847_s14 }
 0x2e6   : > { %p950_p4 = pnand %p955_p2, %p1638_p3 }
 0x2e8   : > { %1080 = dma.done.wait (!%p950_p4), %s848_s16, 256  }
 0x2e9   : > { %1082 = vsyncadd (!%p950_p4), %s848_s16, 4294967040  ;;  %p17_p7 = scmp.ge.s32.totalorder %s1173_s27, 4   ;;  %s1639_s21 = smov %s1089_s22 }
 0x2ea   : > { %s1640_s22 = smov %s1093_s23  ;;  %s1641_s23 = smov %s1184_s30 }
 0x2eb   : > { %s1642_s24 = smov %s1173_s27  ;;  %19 = sbr.rel (!%p17_p7) target bundleno = 4 (0x4), region = 92 }
 0x2f2   :  { %853 = vsyncpa [#allocation3], 1 }
 0x2f3   :  { %855 = vsyncpa [#allocation3 + $0x1], 1 }
 0x2f4   :  { %856 = vsyncpa [#allocation4], 1 }
 0x2f5   :  { %858 = vsyncpa [#allocation4 + $0x1], 1 }

</bundles_post_ra>
